<compile_context>
chip_gen: v7x
topology: tpu7x:2x2x1
jax: 0.10.0
libtpu: 0.0.40
codegen_flags: <defaults>
</compile_context>

<pallas_src>
import functools

import jax
import jax.numpy as jnp
from jax.experimental import pallas as pl
from jax.experimental.pallas import tpu as pltpu


_EPS2 = 1e-8 * 1e-8  # F.cosine_similarity: denom = max(||a||*||b||, eps), eps=1e-8


# --------------------------------------------------------------------------
# Pass 1: per-row cosine-similarity logits  [B, D] x3  ->  [2, B] (lane-dense)
# --------------------------------------------------------------------------
def _logits_kernel(a_ref, p_ref, n_ref, out_ref, *, inv_temperature):
    a = a_ref[...].astype(jnp.float32)   # (TB, D)
    p = p_ref[...].astype(jnp.float32)
    n = n_ref[...].astype(jnp.float32)

    # Anchor squared-norm computed once and reused for both similarities.
    aa = jnp.sum(a * a, axis=-1)   # (TB,)
    pp = jnp.sum(p * p, axis=-1)
    nn = jnp.sum(n * n, axis=-1)
    ap = jnp.sum(a * p, axis=-1)
    an = jnp.sum(a * n, axis=-1)

    # Stack into the lane-dense (2, TB) output orientation and do ONE fused
    # clamp + rsqrt + scale, followed by a single unmasked store.
    num = jnp.concatenate([ap.reshape(1, -1), an.reshape(1, -1)], axis=0)          # (2, TB)
    den = jnp.concatenate(
        [(aa * pp).reshape(1, -1), (aa * nn).reshape(1, -1)], axis=0)              # (2, TB)
    inv_norm = jax.lax.rsqrt(jnp.maximum(den, jnp.float32(_EPS2)))
    out_ref[...] = num * inv_norm * jnp.float32(inv_temperature)


# --------------------------------------------------------------------------
# Pass 2: global std (unbiased) + 2-class cross entropy (label 0) -> scalar
# --------------------------------------------------------------------------
def _finalize_kernel(logits_ref, loss_ref):
    logits = logits_ref[...].astype(jnp.float32)   # (2, B), lane-dense rows
    b = logits.shape[1]
    n_elems = jnp.float32(2 * b)

    mean = jnp.sum(logits) / n_elems
    var = jnp.sum((logits - mean) ** 2) / (n_elems - jnp.float32(1.0))
    inv_std = jax.lax.rsqrt(var)

    # CE with label 0:  loss_i = softplus((l1 - l0) * inv_std)  (stable form)
    d = (logits[1:2, :] - logits[0:1, :]) * inv_std          # (1, B)
    loss_rows = jnp.maximum(d, jnp.float32(0.0)) + jnp.log(
        jnp.float32(1.0) + jnp.exp(-jnp.abs(d))
    )
    loss_ref[0, 0] = jnp.sum(loss_rows) / jnp.float32(b)


# --------------------------------------------------------------------------
# Tiling / VMEM heuristics
# --------------------------------------------------------------------------
def _vmem_params():
    """(vmem_limit_bytes, tile_budget_bytes) derived from the device VMEM."""
    cap = 64 * 1024 * 1024  # conservative fallback (v7x per-core VMEM)
    try:
        cap = int(pltpu.get_tpu_info().vmem_capacity_bytes)
    except Exception:
        pass
    vmem_limit = min(cap * 3 // 4, 100 * 1024 * 1024)  # ~96 MiB v5e/v6e, ~48 MiB v7x
    tile_budget = vmem_limit * 3 // 4                  # ~72 MiB v5e/v6e, ~36 MiB v7x
    return vmem_limit, tile_budget


def _choose_block_rows(B, D, itemsize, tile_budget):
    """Pick the pass-1 row-tile size TB and grid length.

    - Largest TB fitting an honest VMEM budget: 3 inputs x (double-buffered
      native tile + one f32-sized working/upcast copy).
    - TB is a multiple of 128 whenever the batch is tiled so the (2, TB)
      output blocks stay lane-dense / unmasked.
    - For large B the grid length is kept even (>= 2) so v7x's two
      TensorCores split the "parallel" axis evenly.
    """
    d_pad = max(pl.cdiv(D, 128) * 128, 128)
    bytes_per_row = 3 * (2 * itemsize + 4) * d_pad
    tb = min(int(tile_budget // bytes_per_row), 32768)
    if B >= 1024:
        # At least two grid steps so both v7x TensorCores get work.
        tb = min(tb, pl.cdiv(pl.cdiv(B, 2), 128) * 128)
    if tb >= B or B <= 128:
        return B, 1
    tb = max(128, (tb // 128) * 128)
    num_tiles = pl.cdiv(B, tb)
    if num_tiles % 2:                      # balance across 2 TensorCores (v7x)
        num_tiles += 1
        tb = max(128, pl.cdiv(pl.cdiv(B, num_tiles), 128) * 128)
        num_tiles = pl.cdiv(B, tb)
    return tb, num_tiles


# --------------------------------------------------------------------------
# Wrapper
# --------------------------------------------------------------------------
def temperature_loss(anchor, positive, negative, temperature=0.05):
    B, D = anchor.shape
    itemsize = jnp.dtype(anchor.dtype).itemsize
    vmem_limit, tile_budget = _vmem_params()
    tb, num_tiles = _choose_block_rows(B, D, itemsize, tile_budget)

    # Pass 1: batch-tiled, double-buffered, megacore-parallel streaming pass.
    logits = pl.pallas_call(
        functools.partial(_logits_kernel, inv_temperature=1.0 / temperature),
        out_shape=jax.ShapeDtypeStruct((2, B), jnp.float32),
        grid_spec=pltpu.PrefetchScalarGridSpec(
            num_scalar_prefetch=0,
            grid=(num_tiles,),
            in_specs=[
                pl.BlockSpec((tb, D), lambda i: (i, 0)),
                pl.BlockSpec((tb, D), lambda i: (i, 0)),
                pl.BlockSpec((tb, D), lambda i: (i, 0)),
            ],
            out_specs=pl.BlockSpec((2, tb), lambda i: (0, i)),
        ),
        compiler_params=pltpu.CompilerParams(
            dimension_semantics=("parallel",),
            vmem_limit_bytes=vmem_limit,
        ),
        cost_estimate=pl.CostEstimate(
            flops=10 * B * D + 8 * B,
            transcendentals=2 * B,
            bytes_accessed=3 * B * D * itemsize + 2 * B * 4,
        ),
    )(anchor, positive, negative)

    # Pass 2: tiny finalize over the lane-dense [2, B] logits; scalar via SMEM.
    loss = pl.pallas_call(
        _finalize_kernel,
        out_shape=jax.ShapeDtypeStruct((1, 1), jnp.float32),
        in_specs=[pl.BlockSpec((2, B), lambda: (0, 0))],
        out_specs=pl.BlockSpec(memory_space=pltpu.SMEM),
    )(logits)
    return loss[0, 0]


# --------------------------------------------------------------------------
# Pure-JAX reference mirroring the PyTorch forward
# --------------------------------------------------------------------------
def _reference_loss(anchor, positive, negative, temperature=0.05):
    eps = 1e-8

    def cos(x, y):
        dot = jnp.sum(x * y, axis=-1)
        denom = jnp.sqrt(
            jnp.maximum(jnp.sum(x * x, axis=-1) * jnp.sum(y * y, axis=-1), eps * eps)
        )
        return dot / denom

    sp = cos(anchor, positive) / temperature
    sn = cos(anchor, negative) / temperature
    logits = jnp.stack([sp, sn], axis=1)                  # [B, 2]
    logits = logits / jnp.std(logits, ddof=1)             # torch.std is unbiased
    logz = jax.nn.logsumexp(logits, axis=1)
    return jnp.mean(logz - logits[:, 0])


if __name__ == "__main__":
    key = jax.random.PRNGKey(0)

    # Small shape consistent with the module's forward (embeddings [B, D]).
    k1, k2, k3 = jax.random.split(key, 3)
    B, D = 8, 32
    anchor = jax.random.normal(k1, (B, D), dtype=jnp.float32)
    positive = jax.random.normal(k2, (B, D), dtype=jnp.float32)
    negative = jax.random.normal(k3, (B, D), dtype=jnp.float32)

    loss = jax.block_until_ready(
        temperature_loss(anchor, positive, negative, temperature=0.05)
    )
    ref = _reference_loss(anchor, positive, negative, temperature=0.05)
    assert jnp.allclose(loss, ref, rtol=1e-5, atol=1e-5), (loss, ref)

    # Moderate shape exercising the tiled path: B not a multiple of the tile,
    # multiple (even) grid steps, partial last block.
    k4, k5, k6 = jax.random.split(jax.random.PRNGKey(1), 3)
    B2, D2 = 4100, 512
    a2 = jax.random.normal(k4, (B2, D2), dtype=jnp.float32)
    p2 = jax.random.normal(k5, (B2, D2), dtype=jnp.float32)
    n2 = jax.random.normal(k6, (B2, D2), dtype=jnp.float32)

    loss2 = jax.block_until_ready(temperature_loss(a2, p2, n2, temperature=0.05))
    ref2 = _reference_loss(a2, p2, n2, temperature=0.05)
    assert jnp.allclose(loss2, ref2, rtol=1e-4, atol=1e-4), (loss2, ref2)

    print("KERNEL_OK")
</pallas_src>

<mosaic_0001>
module attributes {stable_mosaic.version = 11 : i64} {
  func.func @_logits_kernel(%arg0: i32, %arg1: memref<8x32xf32, #tpu.memory_space<vmem>>, %arg2: memref<8x32xf32, #tpu.memory_space<vmem>>, %arg3: memref<8x32xf32, #tpu.memory_space<vmem>>, %arg4: memref<2x8xf32, #tpu.memory_space<vmem>>) attributes {dimension_semantics = [#tpu.dimension_semantics<parallel>], iteration_bounds = array<i64: 1>, scalar_prefetch = 0 : i64, scratch_operands = 0 : i64, tpu.core_type = #tpu.core_type<tc>, window_params = [{transform_indices = @transform_0, window_bounds = array<i64: 8, 32>}, {transform_indices = @transform_1, window_bounds = array<i64: 8, 32>}, {transform_indices = @transform_2, window_bounds = array<i64: 8, 32>}, {transform_indices = @transform_3, window_bounds = array<i64: 2, 8>}]} {
    %c0 = arith.constant 0 : index
    %c0_0 = arith.constant 0 : index
    %0 = vector.load %arg1[%c0, %c0_0] : memref<8x32xf32, #tpu.memory_space<vmem>>, vector<8x32xf32>
    %c0_1 = arith.constant 0 : index
    %c0_2 = arith.constant 0 : index
    %1 = vector.load %arg2[%c0_1, %c0_2] : memref<8x32xf32, #tpu.memory_space<vmem>>, vector<8x32xf32>
    %c0_3 = arith.constant 0 : index
    %c0_4 = arith.constant 0 : index
    %2 = vector.load %arg3[%c0_3, %c0_4] : memref<8x32xf32, #tpu.memory_space<vmem>>, vector<8x32xf32>
    %3 = arith.mulf %0, %0 : vector<8x32xf32>
    %cst = arith.constant dense<0.000000e+00> : vector<8xf32>
    %4 = vector.multi_reduction <add>, %3, %cst [1] : vector<8x32xf32> to vector<8xf32>
    %5 = arith.mulf %1, %1 : vector<8x32xf32>
    %cst_5 = arith.constant dense<0.000000e+00> : vector<8xf32>
    %6 = vector.multi_reduction <add>, %5, %cst_5 [1] : vector<8x32xf32> to vector<8xf32>
    %7 = arith.mulf %2, %2 : vector<8x32xf32>
    %cst_6 = arith.constant dense<0.000000e+00> : vector<8xf32>
    %8 = vector.multi_reduction <add>, %7, %cst_6 [1] : vector<8x32xf32> to vector<8xf32>
    %9 = arith.mulf %0, %1 : vector<8x32xf32>
    %cst_7 = arith.constant dense<0.000000e+00> : vector<8xf32>
    %10 = vector.multi_reduction <add>, %9, %cst_7 [1] : vector<8x32xf32> to vector<8xf32>
    %11 = arith.mulf %0, %2 : vector<8x32xf32>
    %cst_8 = arith.constant dense<0.000000e+00> : vector<8xf32>
    %12 = vector.multi_reduction <add>, %11, %cst_8 [1] : vector<8x32xf32> to vector<8xf32>
    %13 = vector.shape_cast %10 : vector<8xf32> to vector<1x8xf32>
    %14 = vector.shape_cast %12 : vector<8xf32> to vector<1x8xf32>
    %15 = tpu.concatenate %13, %14 in 0 : vector<1x8xf32>, vector<1x8xf32> -> vector<2x8xf32>
    %16 = arith.mulf %4, %6 : vector<8xf32>
    %17 = vector.shape_cast %16 : vector<8xf32> to vector<1x8xf32>
    %18 = arith.mulf %4, %8 : vector<8xf32>
    %19 = vector.shape_cast %18 : vector<8xf32> to vector<1x8xf32>
    %20 = tpu.concatenate %17, %19 in 0 : vector<1x8xf32>, vector<1x8xf32> -> vector<2x8xf32>
    %cst_9 = arith.constant 1.000000e-16 : f32
    %21 = vector.broadcast %cst_9 : f32 to vector<2x8xf32>
    %22 = arith.maximumf %20, %21 : vector<2x8xf32>
    %23 = math.rsqrt %22 : vector<2x8xf32>
    %24 = arith.mulf %15, %23 : vector<2x8xf32>
    %cst_10 = arith.constant 2.000000e+01 : f32
    %25 = vector.broadcast %cst_10 : f32 to vector<2x8xf32>
    %26 = arith.mulf %24, %25 : vector<2x8xf32>
    %c0_11 = arith.constant 0 : index
    %c0_12 = arith.constant 0 : index
    %27 = vector.load %arg4[%c0_11, %c0_12] : memref<2x8xf32, #tpu.memory_space<vmem>>, vector<2x8xf32>
    tpu.vector_store %arg4[%c0_11, %c0_12], %26 {strides = array<i32>} : memref<2x8xf32, #tpu.memory_space<vmem>>, vector<2x8xf32>,
    return
  }
  func.func @transform_0(%arg0: i32) -> (i32, i32) {
    %c0_i32 = arith.constant 0 : i32
    %c0_i32_0 = arith.constant 0 : i32
    return %arg0, %c0_i32 : i32, i32
  }
  func.func @transform_1(%arg0: i32) -> (i32, i32) {
    %c0_i32 = arith.constant 0 : i32
    %c0_i32_0 = arith.constant 0 : i32
    return %arg0, %c0_i32 : i32, i32
  }
  func.func @transform_2(%arg0: i32) -> (i32, i32) {
    %c0_i32 = arith.constant 0 : i32
    %c0_i32_0 = arith.constant 0 : i32
    return %arg0, %c0_i32 : i32, i32
  }
  func.func @transform_3(%arg0: i32) -> (i32, i32) {
    %c0_i32 = arith.constant 0 : i32
    %c0_i32_0 = arith.constant 0 : i32
    return %c0_i32, %arg0 : i32, i32
  }
}

</mosaic_0001>

<bundles_post_ra>
// kernel: tpu_custom_call.1
= control target key start
LH: loop header
LB: loop body
LE: loop exit
PB: predicated region body
PF: predicated region fallthrough
CT: control target
= control target key end

     0   :  { %8 = vsyncpa [#allocation3], 0  ;;  %s304_s0 = inlined_call_operand.hbm [shape: f32[8,32], index: 0, kind: input, shape index: {}]   ;;  %s305_s1 = inlined_call_operand.hbm [shape: f32[8,32], index: 1, kind: input, shape index: {}]   ;;  %s306_s2 = inlined_call_operand.hbm [shape: f32[8,32], index: 2, kind: input, shape index: {}]   ;;  %s307_s3 = inlined_call_operand.hbm [shape: f32[2,8], index: 3, kind: output, shape index: {}]  }
   0x1   :  { %9 = vsyncpa [#allocation6], 0 }
   0x2   :  { %10 = vsyncpa [#allocation4], 0  ;;  %s227_s12 = smov [#allocation5]   ;;  %s228_s14 = smov [#allocation2]  }
   0x3   :  { %s27_s13 = sshll.u32 %s227_s12, 4  ;;  %s17_s15 = sshll.u32 %s228_s14, 4  ;;  %s28_s13 = int_to_ptr.vmem [resolvable:$true] %s27_s13  ;;  %s18_s15 = int_to_ptr.vmem [resolvable:$true] %s17_s15 }
   0x4   :  { %s133_s18 = scalar_lea.hbm %s305_s1, 128 }
   0x5   :  { %p134_p0 = scmp.ne.s32.totalorder %s305_s1, %s133_s18  ;;  %p137_p1 = scmp.lt.u32.totalorder %s133_s18, %s305_s1 }
   0x7   :  { %p139_p2 = pnand %p137_p1, %p134_p0 }
   0x9   :  { %142 = shalt.err (!%p139_p2)
}
   0xa   :  { %s143_s23 = scalar_lea.vmem %s28_s13, 128  ;;  %p148_p4 = scmp.lt.s32.totalorder %s28_s13, %s28_s13 }
   0xb   :  { %p144_p3 = scmp.ne.s32.totalorder %s28_s13, %s143_s23  ;;  %p149_p5 = scmp.lt.s32.totalorder %s143_s23, %s143_s23 }
   0xd   :  { %p150_p6 = por %p149_p5, %p148_p4 }
   0xf   :  { %p151_p7 = pnand %p150_p6, %p144_p3 }
  0x11   :  { %154 = shalt.err (!%p151_p7)
}
  0x12   :  { %30 = dma.hbm_to_vmem [thread:$0]  %s305_s1, 128, %s28_s13, [#allocation6]  }
  0x13   :  { %s155_s28 = scalar_lea.hbm %s304_s0, 128 }
  0x14   :  { %p156_p8 = scmp.ne.s32.totalorder %s304_s0, %s155_s28  ;;  %p159_p9 = scmp.lt.u32.totalorder %s155_s28, %s304_s0 }
  0x16   :  { %p161_p10 = pnand %p159_p9, %p156_p8 }
  0x18   :  { %164 = shalt.err (!%p161_p10)
}
  0x19   :  { %s165_s6 = scalar_lea.vmem %s18_s15, 128  ;;  %p170_p12 = scmp.lt.s32.totalorder %s18_s15, %s18_s15 }
  0x1a   :  { %p166_p11 = scmp.ne.s32.totalorder %s18_s15, %s165_s6  ;;  %p171_p13 = scmp.lt.s32.totalorder %s165_s6, %s165_s6 }
  0x1c   :  { %p172_p0 = por %p171_p13, %p170_p12 }
  0x1e   :  { %p173_p1 = pnand %p172_p0, %p166_p11 }
  0x20   :  { %176 = shalt.err (!%p173_p1)
}
  0x21   :  { %20 = dma.hbm_to_vmem [thread:$0]  %s304_s0, 128, %s18_s15, [#allocation3]  }
  0x22   :  { %s229_s8 = smov [#allocation7]   ;;  %s177_s12 = scalar_lea.hbm %s306_s2, 128 }
  0x23   :  { %s37_s9 = sshll.u32 %s229_s8, 4  ;;  %p178_p2 = scmp.ne.s32.totalorder %s306_s2, %s177_s12  ;;  %s38_s9 = int_to_ptr.vmem [resolvable:$true] %s37_s9 }
  0x24   :  { %p181_p3 = scmp.lt.u32.totalorder %s177_s12, %s306_s2 }
  0x26   :  { %p183_p4 = pnand %p181_p3, %p178_p2 }
  0x28   :  { %186 = shalt.err (!%p183_p4)
}
  0x29   :  { %s187_s18 = scalar_lea.vmem %s38_s9, 128  ;;  %p192_p6 = scmp.lt.s32.totalorder %s38_s9, %s38_s9 }
  0x2a   :  { %p188_p5 = scmp.ne.s32.totalorder %s38_s9, %s187_s18  ;;  %p193_p7 = scmp.lt.s32.totalorder %s187_s18, %s187_s18 }
  0x2c   :  { %p194_p8 = por %p193_p7, %p192_p6 }
  0x2e   :  { %p195_p9 = pnand %p194_p8, %p188_p5 }
  0x30   :  { %198 = shalt.err (!%p195_p9)
}
  0x31   :  { %40 = dma.hbm_to_vmem [thread:$0]  %s306_s2, 128, %s38_s9, [#allocation6]  }
  0x32   :  { %221 = dma.done.wait [#allocation3], 128  }
  0x33   :  { %222 = vsyncadd [#allocation3], 4294967168 }
  0x34   :  { %223 = dma.done.wait [#allocation6], 256  }
  0x35   :  { %224 = vsyncadd [#allocation6], 4294967040  ;;  %v52_v0 = vld [vmem:[#allocation7] sm:$0xff]  ;;  %vm54_vm0 = vcmask 261120   ;;  %v50_v1 = vld [vmem:[#allocation2] sm:$0xff]  ;;  %v75_v13 = vlaneseq  ;;  %vm88_vm1 = vcmask 1040384  }
  0x36   :  { %v51_v2 = vld [vmem:[#allocation5] sm:$0xff]  ;;  %v62_v3 = vmul.f32 %v52_v0, %v52_v0  ;;  %v53_v4 = vmul.f32 %v50_v1, %v50_v1  ;;  %v70_v11 = vmul.f32 %v52_v0, %v50_v1  ;;  %s230_s2 = smov [#allocation8]   ;;  %vm109_vm2 = vcmask 58368  }
  0x37   :  { %v58_v5 = vmul.f32 %v51_v2, %v51_v2  ;;  %v66_v6 = vmul.f32 %v51_v2, %v50_v1  ;;  %v76_v14 = vand.u32 127, %v75_v13  ;;  %v78_v15 = vshrl.u32 %v75_v13, 7  ;;  %s117_s19 = sshll.u32 %s230_s2, 4  ;;  %s118_s19 = int_to_ptr.vmem [resolvable:$true] %s117_s19 }
  0x38   :  { %v63_v7 = vsel %vm54_vm0, %v62_v3, 0.0  ;;  %v55_v8 = vsel %vm54_vm0, %v53_v4, 0.0  ;;  %v71_v12 = vsel %vm54_vm0, %v70_v11, 0.0  ;;  %s199_s20 = scalar_lea.vmem %s118_s19, 32  ;;  %p204_p11 = scmp.lt.s32.totalorder %s118_s19, %s118_s19 }
  0x39   :  { %64 = vadd.xlane.f32.xlu1 %v63_v7  ;;  %56 = vadd.xlane.f32.xlu0 %v55_v8  ;;  %v59_v9 = vsel %vm54_vm0, %v58_v5, 0.0  ;;  %v67_v10 = vsel %vm54_vm0, %v66_v6, 0.0  ;;  %v79_v18 = vsub.s32 %v76_v14, %v78_v15  ;;  %p200_p10 = scmp.ne.s32.totalorder %s118_s19, %s199_s20  ;;  %p205_p12 = scmp.lt.s32.totalorder %s199_s20, %s199_s20 }
  0x3b   :  { %p206_p13 = por %p205_p12, %p204_p11 }
  0x3d   :  { %60 = vadd.xlane.f32.xlu0 %v59_v9  ;;  %68 = vadd.xlane.f32.xlu1 %v67_v10  ;;  %p207_p0 = pnand %p206_p13, %p200_p10 }
  0x41   :  { %72 = vadd.xlane.f32.xlu0 %v71_v12 }
  0xc6   :  { %v65_v16 = vpop.xlane.xlu1 %64  ;;  %v57_v17 = vpop.xlane.xlu0 %56 }
  0xc7   :  { %v91_v19 = vmul.f32 %v65_v16, %v57_v17 }
  0xc9   :  { %v102_v22 = vrot.slane %v91_v19, %v79_v18 }
  0xca   :  { %v61_v20 = vpop.xlane.xlu0 %60  ;;  %v69_v26 = vpop.xlane.xlu1 %68 }
  0xcb   :  { %v90_v21 = vmul.f32 %v61_v20, %v57_v17  ;;  %v80_v28 = vrot.slane %v69_v26, %v79_v18 }
  0xcd   :  { %v96_v23 = vrot.slane %v90_v21, %v79_v18 }
  0xce   :  { %v73_v27 = vpop.xlane.xlu0 %72 }
  0xcf   :  { %v104_v24 = vsel %vm88_vm1, %v96_v23, %v102_v22  ;;  %v86_v29 = vrot.slane %v73_v27, %v79_v18 }
  0xd0   :  { %v105_v25 = vmax.f32 %v104_v24, 1e-16 }
  0xd1   :  { %v89_v30 = vsel %vm88_vm1, %v80_v28, %v86_v29 }
  0xd2   :  { %131 = vrsqrt.f32 %v105_v25 }
  0xdc   :  { %v132_v31 = vpop.eup %131 }
  0xdd   :  { %v107_v32 = vmul.f32 %v132_v31, %v89_v30 }
  0xdf   :  { %v108_v33 = vmul.f32 20.0, %v107_v32 }
  0xe1   :  { %110 = vst.msk [vmem:[#allocation8] sm:$0x3] %vm109_vm2, %v108_v33 }
  0xe2   :  { %210 = shalt.err (!%p207_p0)
}
  0xe3   :  { %s211_s23 = scalar_lea.hbm %s307_s3, 32 }
  0xe4   :  { %p212_p1 = scmp.ne.s32.totalorder %s307_s3, %s211_s23  ;;  %p215_p2 = scmp.lt.u32.totalorder %s211_s23, %s307_s3 }
  0xe6   :  { %p217_p3 = pnand %p215_p2, %p212_p1 }
  0xe8   :  { %220 = shalt.err (!%p217_p3)
}
  0xe9   :  { %120 = dma.vmem_to_hbm [thread:$0]  %s118_s19, 32, %s307_s3, [#allocation4]  }
  0xea   :  { %225 = dma.done.wait [#allocation4], 32  }
  0xeb   :  { %226 = vsyncadd [#allocation4], 4294967264 }
  0xec   :  { %124 = vsyncpa [#allocation3], 1 }
  0xed   :  { %125 = vsyncpa [#allocation6], 1 }
  0xee   :  { %126 = vsyncpa [#allocation4], 1 }

</bundles_post_ra>
